<compile_context>
chip_gen: v7x
topology: tpu7x:2x2x1
jax: 0.10.0
libtpu: 0.0.40
codegen_flags: <defaults>
</compile_context>

<pallas_src>
import math
from functools import partial

import jax
import jax.numpy as jnp
from jax.experimental import pallas as pl
from jax.experimental.pallas import tpu as pltpu

BN_EPS = 1e-5


def _round_up(x, m):
    return (x + m - 1) // m * m


# -----------------------------------------------------------------------------
# Fully fused MLPHead kernel:
#   o = ((relu((x @ w1) * s1 + b1)) @ w2) * s2 + b2
# (s/b are the folded Linear-bias + BatchNorm scale/shift rows.)
# -----------------------------------------------------------------------------
def _mlp_head_kernel(x_ref, w1_ref, s1_ref, b1_ref, w2_ref, s2_ref, b2_ref,
                     o_ref):
    # Layer 1: Linear + folded BN + ReLU (f32 epilogue).
    h = jnp.dot(x_ref[...], w1_ref[...], preferred_element_type=jnp.float32)
    h = jnp.maximum(h * s1_ref[...] + b1_ref[...], 0.0)
    # Layer 2: Linear + folded BN(affine=False). h fed to the MXU as bf16.
    y = jnp.dot(h.astype(jnp.bfloat16), w2_ref[...],
                preferred_element_type=jnp.float32)
    o_ref[...] = (y * s2_ref[...] + b2_ref[...]).astype(o_ref.dtype)


def _fused_vmem_bytes(tm, k1p, n1p, n2p):
    bf16, f32 = 2, 4
    x_tiles = 2 * tm * k1p * bf16               # double-buffered x tiles
    o_tiles = 2 * tm * n2p * f32                # double-buffered out tiles
    weights = 2 * (k1p * n1p + n1p * n2p) * bf16
    vectors = 2 * 2 * (n1p + n2p) * f32         # scale/shift rows
    interm = tm * n1p * (f32 + bf16)            # h (f32) + bf16 copy
    return x_tiles + o_tiles + weights + vectors + interm


def mlp_head_forward(params, x, *, projection_size):
    """x: [M, in_channels] f32 -> [M, projection_size] f32 (eval-mode BN)."""
    M, K = x.shape
    K1p, N1p = params['w1'].shape
    N1p_b, N2p = params['w2'].shape
    assert N1p_b == N1p and K <= K1p        # static (array-shape) checks only

    # --- M tiling (bf16 packs 16 rows per vreg) ------------------------------
    if M <= 256:
        Mp = _round_up(max(M, 16), 16)
        tm = Mp
    else:
        tm = 256
        Mp = _round_up(M, tm)

    # Pad + cast the activation once; weights/scales were padded at init.
    xp = jnp.pad(x, ((0, Mp - M), (0, K1p - K))).astype(jnp.bfloat16)

    vmem_bytes = min(max(2 * _fused_vmem_bytes(tm, K1p, N1p, N2p),
                         16 * 1024 * 1024),
                     48 * 1024 * 1024)

    out = pl.pallas_call(
        _mlp_head_kernel,
        out_shape=jax.ShapeDtypeStruct((Mp, N2p), jnp.float32),
        grid_spec=pltpu.PrefetchScalarGridSpec(
            num_scalar_prefetch=0,
            grid=(Mp // tm,),
            in_specs=[
                pl.BlockSpec((tm, K1p), lambda i: (i, 0)),     # x tile
                pl.BlockSpec((K1p, N1p), lambda i: (0, 0)),    # w1 (resident)
                pl.BlockSpec((1, N1p), lambda i: (0, 0)),      # scale1
                pl.BlockSpec((1, N1p), lambda i: (0, 0)),      # shift1
                pl.BlockSpec((N1p, N2p), lambda i: (0, 0)),    # w2 (resident)
                pl.BlockSpec((1, N2p), lambda i: (0, 0)),      # scale2
                pl.BlockSpec((1, N2p), lambda i: (0, 0)),      # shift2
            ],
            out_specs=pl.BlockSpec((tm, N2p), lambda i: (i, 0)),
        ),
        compiler_params=pltpu.CompilerParams(
            dimension_semantics=("parallel",),
            vmem_limit_bytes=vmem_bytes),
    )(xp, params['w1'], params['s1'], params['b1'],
      params['w2'], params['s2'], params['b2'])

    return out[:M, :projection_size]


# -----------------------------------------------------------------------------
# Deterministic synthetic parameters (folded, padded, bf16 weights at init)
# -----------------------------------------------------------------------------
def _make_rng(seed):
    key = jax.random.PRNGKey(seed)

    def nxt():
        nonlocal key
        key, sub = jax.random.split(key)
        return sub
    return nxt


def _init_layer(nxt, din, dout, *, affine, eps=BN_EPS):
    w = jax.random.normal(nxt(), (din, dout), jnp.float32) * math.sqrt(2.0 / din)
    b = 0.01 * jax.random.normal(nxt(), (dout,), jnp.float32)
    if affine:
        gamma = 1.0 + 0.1 * jax.random.normal(nxt(), (dout,), jnp.float32)
        beta = 0.1 * jax.random.normal(nxt(), (dout,), jnp.float32)
    else:                                     # BatchNorm1d(affine=False)
        gamma = jnp.ones((dout,), jnp.float32)
        beta = jnp.zeros((dout,), jnp.float32)
    mean = 0.1 * jax.random.normal(nxt(), (dout,), jnp.float32)
    var = 0.5 + jax.random.uniform(nxt(), (dout,), jnp.float32)

    inv = gamma * jax.lax.rsqrt(var + eps)
    scale = inv                               # applied to (x @ W)
    shift = (b - mean) * inv + beta           # linear bias + BN folded together

    kp = _round_up(din, 128)
    np_ = _round_up(dout, 128)
    w_p = jnp.pad(w, ((0, kp - din), (0, np_ - dout))).astype(jnp.bfloat16)
    scale_p = jnp.pad(scale, (0, np_ - dout)).reshape(1, np_).astype(jnp.float32)
    shift_p = jnp.pad(shift, (0, np_ - dout)).reshape(1, np_).astype(jnp.float32)

    ref = {'w': w, 'b': b, 'gamma': gamma, 'beta': beta, 'mean': mean, 'var': var}
    return (w_p, scale_p, shift_p), ref


def init_mlp_head_params(seed, in_channels, mlp_hidden_size, projection_size):
    nxt = _make_rng(seed)
    (w1, s1, b1), ref1 = _init_layer(nxt, in_channels, mlp_hidden_size, affine=True)
    (w2, s2, b2), ref2 = _init_layer(nxt, mlp_hidden_size, projection_size, affine=False)
    params = {'w1': w1, 's1': s1, 'b1': b1, 'w2': w2, 's2': s2, 'b2': b2}
    ref_params = {'layer1': ref1, 'layer2': ref2}
    return params, ref_params


# -----------------------------------------------------------------------------
# Pure-JAX reference (mirrors the kernel's bf16 operand rounding)
# -----------------------------------------------------------------------------
def mlp_head_reference(ref_params, x, eps=BN_EPS):
    def layer(h, r, relu):
        y = jnp.dot(h.astype(jnp.bfloat16).astype(jnp.float32),
                    r['w'].astype(jnp.bfloat16).astype(jnp.float32)) + r['b']
        y = (y - r['mean']) * jax.lax.rsqrt(r['var'] + eps) * r['gamma'] + r['beta']
        return jnp.maximum(y, 0.0) if relu else y

    h = layer(x, ref_params['layer1'], True)
    return layer(h, ref_params['layer2'], False)


# -----------------------------------------------------------------------------
# Demo
# -----------------------------------------------------------------------------
if __name__ == "__main__":
    BATCH, IN_CHANNELS, MLP_HIDDEN, PROJECTION = 2, 256, 512, 128

    params, ref_params = init_mlp_head_params(0, IN_CHANNELS, MLP_HIDDEN,
                                              PROJECTION)
    x = jax.random.normal(jax.random.PRNGKey(0), (BATCH, IN_CHANNELS),
                          jnp.float32)

    fwd = jax.jit(partial(mlp_head_forward, projection_size=PROJECTION))
    out = fwd(params, x)
    jax.block_until_ready(out)

    assert out.shape == (BATCH, PROJECTION)
    assert bool(jnp.all(jnp.isfinite(out)))

    ref = mlp_head_reference(ref_params, x)
    assert bool(jnp.allclose(out, ref, rtol=5e-2, atol=5e-2)), \
        float(jnp.max(jnp.abs(out - ref)))

    print("KERNEL_OK")
</pallas_src>

<mosaic_0001>
module attributes {stable_mosaic.version = 11 : i64} {
  func.func @_mlp_head_kernel(%arg0: i32, %arg1: memref<16x256xbf16, #tpu.memory_space<vmem>>, %arg2: memref<256x512xbf16, #tpu.memory_space<vmem>>, %arg3: memref<1x512xf32, #tpu.memory_space<vmem>>, %arg4: memref<1x512xf32, #tpu.memory_space<vmem>>, %arg5: memref<512x128xbf16, #tpu.memory_space<vmem>>, %arg6: memref<1x128xf32, #tpu.memory_space<vmem>>, %arg7: memref<1x128xf32, #tpu.memory_space<vmem>>, %arg8: memref<16x128xf32, #tpu.memory_space<vmem>>) attributes {dimension_semantics = [#tpu.dimension_semantics<parallel>], iteration_bounds = array<i64: 1>, scalar_prefetch = 0 : i64, scratch_operands = 0 : i64, tpu.core_type = #tpu.core_type<tc>, window_params = [{transform_indices = @transform_0, window_bounds = array<i64: 16, 256>}, {pipeline_mode = #tpu.pipeline_mode<synchronous>, transform_indices = @transform_1, window_bounds = array<i64: 256, 512>}, {pipeline_mode = #tpu.pipeline_mode<synchronous>, transform_indices = @transform_2, window_bounds = array<i64: 1, 512>}, {pipeline_mode = #tpu.pipeline_mode<synchronous>, transform_indices = @transform_3, window_bounds = array<i64: 1, 512>}, {pipeline_mode = #tpu.pipeline_mode<synchronous>, transform_indices = @transform_4, window_bounds = array<i64: 512, 128>}, {pipeline_mode = #tpu.pipeline_mode<synchronous>, transform_indices = @transform_5, window_bounds = array<i64: 1, 128>}, {pipeline_mode = #tpu.pipeline_mode<synchronous>, transform_indices = @transform_6, window_bounds = array<i64: 1, 128>}, {transform_indices = @transform_7, window_bounds = array<i64: 16, 128>}]} {
    %c0 = arith.constant 0 : index
    %c0_0 = arith.constant 0 : index
    %0 = vector.load %arg1[%c0, %c0_0] : memref<16x256xbf16, #tpu.memory_space<vmem>>, vector<16x256xbf16>
    %c0_1 = arith.constant 0 : index
    %c0_2 = arith.constant 0 : index
    %1 = vector.load %arg2[%c0_1, %c0_2] : memref<256x512xbf16, #tpu.memory_space<vmem>>, vector<256x512xbf16>
    %cst = arith.constant dense<0.000000e+00> : vector<16x512xf32>
    %2 = tpu.matmul %0, %1, %cst {dimension_numbers = #tpu.dot_dimension_numbers<[1], [0], [0], [1], [0, 0, 1, 1], [], []>} : vector<16x256xbf16>, vector<256x512xbf16>, vector<16x512xf32> -> vector<16x512xf32>
    %c0_3 = arith.constant 0 : index
    %c0_4 = arith.constant 0 : index
    %3 = vector.load %arg3[%c0_3, %c0_4] : memref<1x512xf32, #tpu.memory_space<vmem>>, vector<1x512xf32>
    %4 = vector.broadcast %3 : vector<1x512xf32> to vector<16x512xf32>
    %5 = arith.mulf %2, %4 : vector<16x512xf32>
    %c0_5 = arith.constant 0 : index
    %c0_6 = arith.constant 0 : index
    %6 = vector.load %arg4[%c0_5, %c0_6] : memref<1x512xf32, #tpu.memory_space<vmem>>, vector<1x512xf32>
    %7 = vector.broadcast %6 : vector<1x512xf32> to vector<16x512xf32>
    %8 = arith.addf %5, %7 : vector<16x512xf32>
    %cst_7 = arith.constant 0.000000e+00 : f32
    %9 = vector.broadcast %cst_7 : f32 to vector<16x512xf32>
    %10 = arith.maximumf %8, %9 : vector<16x512xf32>
    %11 = arith.truncf %10 : vector<16x512xf32> to vector<16x512xbf16>
    %c0_8 = arith.constant 0 : index
    %c0_9 = arith.constant 0 : index
    %12 = vector.load %arg5[%c0_8, %c0_9] : memref<512x128xbf16, #tpu.memory_space<vmem>>, vector<512x128xbf16>
    %cst_10 = arith.constant dense<0.000000e+00> : vector<16x128xf32>
    %13 = tpu.matmul %11, %12, %cst_10 {dimension_numbers = #tpu.dot_dimension_numbers<[1], [0], [0], [1], [0, 0, 1, 1], [], []>} : vector<16x512xbf16>, vector<512x128xbf16>, vector<16x128xf32> -> vector<16x128xf32>
    %c0_11 = arith.constant 0 : index
    %c0_12 = arith.constant 0 : index
    %14 = vector.load %arg6[%c0_11, %c0_12] : memref<1x128xf32, #tpu.memory_space<vmem>>, vector<1x128xf32>
    %15 = vector.broadcast %14 : vector<1x128xf32> to vector<16x128xf32>
    %16 = arith.mulf %13, %15 : vector<16x128xf32>
    %c0_13 = arith.constant 0 : index
    %c0_14 = arith.constant 0 : index
    %17 = vector.load %arg7[%c0_13, %c0_14] : memref<1x128xf32, #tpu.memory_space<vmem>>, vector<1x128xf32>
    %18 = vector.broadcast %17 : vector<1x128xf32> to vector<16x128xf32>
    %19 = arith.addf %16, %18 : vector<16x128xf32>
    %c0_15 = arith.constant 0 : index
    %c0_16 = arith.constant 0 : index
    %20 = vector.load %arg8[%c0_15, %c0_16] : memref<16x128xf32, #tpu.memory_space<vmem>>, vector<16x128xf32>
    tpu.vector_store %arg8[%c0_15, %c0_16], %19 {strides = array<i32>} : memref<16x128xf32, #tpu.memory_space<vmem>>, vector<16x128xf32>,
    return
  }
  func.func @transform_0(%arg0: i32) -> (i32, i32) {
    %c0_i32 = arith.constant 0 : i32
    %c0_i32_0 = arith.constant 0 : i32
    return %arg0, %c0_i32 : i32, i32
  }
  func.func @transform_1(%arg0: i32) -> (i32, i32) {
    %c0_i32 = arith.constant 0 : i32
    %c0_i32_0 = arith.constant 0 : i32
    %c0_i32_1 = arith.constant 0 : i32
    return %c0_i32, %c0_i32_0 : i32, i32
  }
  func.func @transform_2(%arg0: i32) -> (i32, i32) {
    %c0_i32 = arith.constant 0 : i32
    %c0_i32_0 = arith.constant 0 : i32
    %c0_i32_1 = arith.constant 0 : i32
    return %c0_i32, %c0_i32_0 : i32, i32
  }
  func.func @transform_3(%arg0: i32) -> (i32, i32) {
    %c0_i32 = arith.constant 0 : i32
    %c0_i32_0 = arith.constant 0 : i32
    %c0_i32_1 = arith.constant 0 : i32
    return %c0_i32, %c0_i32_0 : i32, i32
  }
  func.func @transform_4(%arg0: i32) -> (i32, i32) {
    %c0_i32 = arith.constant 0 : i32
    %c0_i32_0 = arith.constant 0 : i32
    %c0_i32_1 = arith.constant 0 : i32
    return %c0_i32, %c0_i32_0 : i32, i32
  }
  func.func @transform_5(%arg0: i32) -> (i32, i32) {
    %c0_i32 = arith.constant 0 : i32
    %c0_i32_0 = arith.constant 0 : i32
    %c0_i32_1 = arith.constant 0 : i32
    return %c0_i32, %c0_i32_0 : i32, i32
  }
  func.func @transform_6(%arg0: i32) -> (i32, i32) {
    %c0_i32 = arith.constant 0 : i32
    %c0_i32_0 = arith.constant 0 : i32
    %c0_i32_1 = arith.constant 0 : i32
    return %c0_i32, %c0_i32_0 : i32, i32
  }
  func.func @transform_7(%arg0: i32) -> (i32, i32) {
    %c0_i32 = arith.constant 0 : i32
    %c0_i32_0 = arith.constant 0 : i32
    return %arg0, %c0_i32 : i32, i32
  }
}

</mosaic_0001>

<bundles_post_ra>
// kernel: mlp_head_forward.1
= control target key start
LH: loop header
LB: loop body
LE: loop exit
PB: predicated region body
PF: predicated region fallthrough
CT: control target
= control target key end

     0   :  { %12 = vsyncpa [#allocation3], 0  ;;  %s1396_s0 = inlined_call_operand.vmem [shape: bf16[16,256], index: 0, kind: input, shape index: {}]   ;;  %s1397_s1 = inlined_call_operand.hbm [shape: bf16[256,512], index: 1, kind: input, shape index: {}]   ;;  %s1398_s2 = inlined_call_operand.vmem [shape: f32[1,512], index: 2, kind: input, shape index: {}]   ;;  %s1399_s3 = inlined_call_operand.vmem [shape: f32[1,512], index: 3, kind: input, shape index: {}]   ;;  %s1400_s4 = inlined_call_operand.hbm [shape: bf16[512,128], index: 4, kind: input, shape index: {}]   ;;  %s1401_s5 = inlined_call_operand.vmem [shape: f32[1,128], index: 5, kind: input, shape index: {}]   ;;  %s1402_s6 = inlined_call_operand.vmem [shape: f32[1,128], index: 6, kind: input, shape index: {}]   ;;  %s1403_s7 = inlined_call_operand.vmem [shape: f32[16,128], index: 7, kind: output, shape index: {}]  }
   0x1   :  { %13 = vsyncpa [#allocation5], 0  ;;  %s1302_s24 = smov [#allocation2]   ;;  %s1254_s28 = scalar_lea.hbm %s1397_s1, 8192 }
   0x2   :  { %s21_s25 = sshll.u32 %s1302_s24, 4  ;;  %p1255_p0 = scmp.ne.s32.totalorder %s1397_s1, %s1254_s28  ;;  %s22_s25 = int_to_ptr.vmem [resolvable:$true] %s21_s25 }
   0x3   :  { %p1258_p1 = scmp.lt.u32.totalorder %s1254_s28, %s1397_s1 }
   0x5   :  { %p1260_p2 = pnand %p1258_p1, %p1255_p0 }
   0x7   :  { %1263 = shalt.err (!%p1260_p2)
}
   0x8   :  { %s1264_s10 = scalar_lea.vmem %s22_s25, 8192  ;;  %p1269_p4 = scmp.lt.s32.totalorder %s22_s25, %s22_s25 }
   0x9   :  { %p1265_p3 = scmp.ne.s32.totalorder %s22_s25, %s1264_s10  ;;  %p1270_p5 = scmp.lt.s32.totalorder %s1264_s10, %s1264_s10 }
   0xb   :  { %p1271_p6 = por %p1270_p5, %p1269_p4 }
   0xd   :  { %p1272_p7 = pnand %p1271_p6, %p1265_p3 }
   0xf   :  { %1275 = shalt.err (!%p1272_p7)
}
  0x10   :  { %s1303_s11 = smov 256   ;;  %s1304_s12 = smov 16  }
  0x11   :  { %27 = dma.hbm_to_vmem [thread:$0]  %s1397_s1, 8192, %s22_s25, [#allocation3], %s1303_s11, %s1303_s11, %s1304_s12  }
  0x12   :  { %s1305_s15 = smov [#allocation4]   ;;  %s1276_s19 = scalar_lea.hbm %s1400_s4, 4096 }
  0x13   :  { %s37_s16 = sshll.u32 %s1305_s15, 4  ;;  %p1277_p8 = scmp.ne.s32.totalorder %s1400_s4, %s1276_s19  ;;  %s38_s16 = int_to_ptr.vmem [resolvable:$true] %s37_s16 }
  0x14   :  { %p1280_p9 = scmp.lt.u32.totalorder %s1276_s19, %s1400_s4 }
  0x16   :  { %p1282_p10 = pnand %p1280_p9, %p1277_p8 }
  0x18   :  { %1285 = shalt.err (!%p1282_p10)
}
  0x19   :  { %s1286_s24 = scalar_lea.vmem %s38_s16, 4096  ;;  %p1291_p12 = scmp.lt.s32.totalorder %s38_s16, %s38_s16 }
  0x1a   :  { %p1287_p11 = scmp.ne.s32.totalorder %s38_s16, %s1286_s24  ;;  %p1292_p13 = scmp.lt.s32.totalorder %s1286_s24, %s1286_s24 }
  0x1c   :  { %p1293_p0 = por %p1292_p13, %p1291_p12 }
  0x1e   :  { %p1294_p1 = pnand %p1293_p0, %p1287_p11 }
  0x20   :  { %1297 = shalt.err (!%p1294_p1)
}
  0x21   :  { %s1306_s1 = smov 64   ;;  %s1307_s25 = smov 4  }
  0x22   :  { %43 = dma.hbm_to_vmem [thread:$0]  %s1400_s4, 4096, %s38_s16, [#allocation5], %s1306_s1, %s1306_s1, %s1307_s25  }
  0x23   :  { %1298 = dma.done.wait [#allocation3], 8192  }
  0x24   :  { %1299 = vsyncadd [#allocation3], 4294959104 }
  0x25   :  { %1300 = dma.done.wait [#allocation5], 4096  }
  0x26   :  { %1301 = vsyncadd [#allocation5], 4294963200  ;;  %v1123_v0 = vld [vmem:[#allocation2 + $0x4] ss:$16 sps:$4 sm:$0xff]   ;;  %v1125_v1 = vld [vmem:[#allocation2 + $0xc] ss:$16 sps:$4 sm:$0xff]  }
  0x27   :  { %451 = vmatprep.subr.bf16.mxu0 %v1123_v0  ;;  %v1127_v2 = vld [vmem:[#allocation2] ss:$16 sps:$4 sm:$0xff]   ;;  %v1128_v3 = vld [vmem:[#allocation2 + $0x8] ss:$16 sps:$4 sm:$0xff]   ;;  %494 = vmatprep.subr.bf16.mxu1 %v1125_v1  ;;  %v1129_v4 = vld [vmem:[#allocation2 + $0x24] ss:$16 sps:$4 sm:$0xff]  }
  0x28   :  { %452 = vmatpush1.bf16.msra.mxu0 %v1127_v2  ;;  %495 = vmatpush1.bf16.msra.mxu1 %v1128_v3  ;;  %v1131_v5 = vld [vmem:[#allocation2 + $0x2c] ss:$16 sps:$4 sm:$0xff]   ;;  %v1133_v6 = vld [vmem:[#allocation2 + $0x20] ss:$16 sps:$4 sm:$0xff]   ;;  %v1134_v7 = vld [vmem:[#allocation2 + $0x28] ss:$16 sps:$4 sm:$0xff]  }
  0x29   :  { %453 = vmatprep.subr.bf16.mxu0 %v1129_v4  ;;  %496 = vmatprep.subr.bf16.mxu1 %v1131_v5  ;;  %v1135_v8 = vld [vmem:[#allocation2 + $0x44] ss:$16 sps:$4 sm:$0xff]   ;;  %v1137_v9 = vld [vmem:[#allocation2 + $0x4c] ss:$16 sps:$4 sm:$0xff]   ;;  %v1139_v10 = vld [vmem:[#allocation2 + $0x40] ss:$16 sps:$4 sm:$0xff]  }
  0x2a   :  { %v1140_v11 = vld [vmem:[#allocation2 + $0x48] ss:$16 sps:$4 sm:$0xff]   ;;  %v1141_v12 = vld [vmem:[#allocation2 + $0x64] ss:$16 sps:$4 sm:$0xff]   ;;  %v1143_v13 = vld [vmem:[#allocation2 + $0x6c] ss:$16 sps:$4 sm:$0xff]  }
  0x2b   :  { %v1145_v14 = vld [vmem:[#allocation2 + $0x60] ss:$16 sps:$4 sm:$0xff]   ;;  %v1146_v15 = vld [vmem:[#allocation2 + $0x68] ss:$16 sps:$4 sm:$0xff]   ;;  %v1147_v16 = vld [vmem:[#allocation2 + $0x84] ss:$16 sps:$4 sm:$0xff]  }
  0x2c   :  { %454 = vmatpush1.bf16.msra.mxu0 %v1133_v6  ;;  %497 = vmatpush1.bf16.msra.mxu1 %v1134_v7  ;;  %v1149_v17 = vld [vmem:[#allocation2 + $0x8c] ss:$16 sps:$4 sm:$0xff]   ;;  %v1151_v18 = vld [vmem:[#allocation2 + $0x80] ss:$16 sps:$4 sm:$0xff]   ;;  %v1152_v19 = vld [vmem:[#allocation2 + $0x88] ss:$16 sps:$4 sm:$0xff]  }
  0x2d   :  { %455 = vmatprep.subr.bf16.mxu0 %v1135_v8  ;;  %498 = vmatprep.subr.bf16.mxu1 %v1137_v9  ;;  %v1153_v20 = vld [vmem:[#allocation2 + $0xa4] ss:$16 sps:$4 sm:$0xff]   ;;  %v1155_v21 = vld [vmem:[#allocation2 + $0xac] ss:$16 sps:$4 sm:$0xff]   ;;  %v1157_v22 = vld [vmem:[#allocation2 + $0xa0] ss:$16 sps:$4 sm:$0xff]  }
  0x2e   :  { %v1158_v23 = vld [vmem:[#allocation2 + $0xa8] ss:$16 sps:$4 sm:$0xff]   ;;  %v1159_v24 = vld [vmem:[#allocation2 + $0xc4] ss:$16 sps:$4 sm:$0xff]   ;;  %v1161_v25 = vld [vmem:[#allocation2 + $0xcc] ss:$16 sps:$4 sm:$0xff]  }
  0x2f   :  { %v1163_v26 = vld [vmem:[#allocation2 + $0xc0] ss:$16 sps:$4 sm:$0xff]   ;;  %v1164_v27 = vld [vmem:[#allocation2 + $0xc8] ss:$16 sps:$4 sm:$0xff]   ;;  %v1165_v28 = vld [vmem:[#allocation2 + $0xe4] ss:$16 sps:$4 sm:$0xff]  }
  0x30   :  { %456 = vmatpush1.bf16.msra.mxu0 %v1139_v10  ;;  %499 = vmatpush1.bf16.msra.mxu1 %v1140_v11  ;;  %v1167_v29 = vld [vmem:[#allocation2 + $0xec] ss:$16 sps:$4 sm:$0xff]   ;;  %v1169_v30 = vld [vmem:[#allocation2 + $0xe0] ss:$16 sps:$4 sm:$0xff]   ;;  %v1170_v31 = vld [vmem:[#allocation2 + $0xe8] ss:$16 sps:$4 sm:$0xff]  }
  0x31   :  { %457 = vmatprep.subr.bf16.mxu0 %v1141_v12  ;;  %500 = vmatprep.subr.bf16.mxu1 %v1143_v13  ;;  %v1171_v32 = vld [vmem:[#allocation2 + $0x104] ss:$16 sps:$4 sm:$0xff]   ;;  %v1173_v33 = vld [vmem:[#allocation2 + $0x10c] ss:$16 sps:$4 sm:$0xff]   ;;  %v1175_v34 = vld [vmem:[#allocation2 + $0x100] ss:$16 sps:$4 sm:$0xff]  }
  0x32   :  { %v1176_v35 = vld [vmem:[#allocation2 + $0x108] ss:$16 sps:$4 sm:$0xff]   ;;  %v1177_v36 = vld [vmem:[#allocation2 + $0x124] ss:$16 sps:$4 sm:$0xff]   ;;  %v1179_v37 = vld [vmem:[#allocation2 + $0x12c] ss:$16 sps:$4 sm:$0xff]  }
  0x33   :  { %v1181_v38 = vld [vmem:[#allocation2 + $0x120] ss:$16 sps:$4 sm:$0xff]   ;;  %v1182_v39 = vld [vmem:[#allocation2 + $0x128] ss:$16 sps:$4 sm:$0xff]   ;;  %v1183_v40 = vld [vmem:[#allocation2 + $0x144] ss:$16 sps:$4 sm:$0xff]  }
  0x34   :  { %458 = vmatpush1.bf16.msra.mxu0 %v1145_v14  ;;  %501 = vmatpush1.bf16.msra.mxu1 %v1146_v15  ;;  %v1185_v41 = vld [vmem:[#allocation2 + $0x14c] ss:$16 sps:$4 sm:$0xff]   ;;  %v1187_v42 = vld [vmem:[#allocation2 + $0x140] ss:$16 sps:$4 sm:$0xff]   ;;  %v1188_v43 = vld [vmem:[#allocation2 + $0x148] ss:$16 sps:$4 sm:$0xff]  }
  0x35   :  { %459 = vmatprep.subr.bf16.mxu0 %v1147_v16  ;;  %502 = vmatprep.subr.bf16.mxu1 %v1149_v17  ;;  %v1189_v44 = vld [vmem:[#allocation2 + $0x164] ss:$16 sps:$4 sm:$0xff]   ;;  %v1191_v45 = vld [vmem:[#allocation2 + $0x16c] ss:$16 sps:$4 sm:$0xff]   ;;  %v1193_v46 = vld [vmem:[#allocation2 + $0x160] ss:$16 sps:$4 sm:$0xff]  }
  0x36   :  { %v1194_v47 = vld [vmem:[#allocation2 + $0x168] ss:$16 sps:$4 sm:$0xff]   ;;  %v1221_v48 = vld [vmem:[%s1396_s0 + $0x4] ss:$8 sps:$4 sm:$0xff]   ;;  %v1199_v51 = vld [vmem:[#allocation2 + $0x180] ss:$16 sps:$4 sm:$0xff]  }
  0x37   :  { %v1195_v49 = vld [vmem:[#allocation2 + $0x184] ss:$16 sps:$4 sm:$0xff]   ;;  %v1197_v50 = vld [vmem:[#allocation2 + $0x18c] ss:$16 sps:$4 sm:$0xff]   ;;  %483 = vmatprep.mubr.bf16.mxu0 %v1221_v48  ;;  %526 = vmatprep.mubr.bf16.mxu1 %v1221_v48  ;;  %v1200_v52 = vld [vmem:[#allocation2 + $0x188] ss:$16 sps:$4 sm:$0xff]  }
  0x38   :  { %460 = vmatpush1.bf16.msra.mxu0 %v1151_v18  ;;  %503 = vmatpush1.bf16.msra.mxu1 %v1152_v19  ;;  %v1201_v53 = vld [vmem:[#allocation2 + $0x1a4] ss:$16 sps:$4 sm:$0xff]   ;;  %v1203_v54 = vld [vmem:[#allocation2 + $0x1ac] ss:$16 sps:$4 sm:$0xff]   ;;  %v1205_v55 = vld [vmem:[#allocation2 + $0x1a0] ss:$16 sps:$4 sm:$0xff]  }
  0x39   :  { %461 = vmatprep.subr.bf16.mxu0 %v1153_v20  ;;  %504 = vmatprep.subr.bf16.mxu1 %v1155_v21  ;;  %v1206_v56 = vld [vmem:[#allocation2 + $0x1a8] ss:$16 sps:$4 sm:$0xff]   ;;  %v1207_v57 = vld [vmem:[#allocation2 + $0x1c4] ss:$16 sps:$4 sm:$0xff]   ;;  %v1209_v58 = vld [vmem:[#allocation2 + $0x1cc] ss:$16 sps:$4 sm:$0xff]  }
  0x3a   :  { %v1211_v59 = vld [vmem:[#allocation2 + $0x1c0] ss:$16 sps:$4 sm:$0xff]   ;;  %v1212_v60 = vld [vmem:[#allocation2 + $0x1c8] ss:$16 sps:$4 sm:$0xff]   ;;  %v1213_v61 = vld [vmem:[#allocation2 + $0x1e4] ss:$16 sps:$4 sm:$0xff]  }
  0x3b   :  { %v1215_v62 = vld [vmem:[#allocation2 + $0x1ec] ss:$16 sps:$4 sm:$0xff]   ;;  %v1217_v63 = vld [vmem:[#allocation2 + $0x1e0] ss:$16 sps:$4 sm:$0xff]   ;;  %v1218_v0 = vld [vmem:[#allocation2 + $0x1e8] ss:$16 sps:$4 sm:$0xff]  }
  0x3c   :  { %462 = vmatpush1.bf16.msra.mxu0 %v1157_v22  ;;  %505 = vmatpush1.bf16.msra.mxu1 %v1158_v23  ;;  %v1222_v1 = vld [vmem:[#allocation4 + $0x40] sm:$0xff]   ;;  %v1226_v6 = vld [vmem:[#allocation4 + $0x48] sm:$0xff]   ;;  %v1230_v10 = vld [vmem:[#allocation4 + $0x50] sm:$0xff]  }
  0x3d   :  { %463 = vmatprep.subr.bf16.mxu0 %v1159_v24  ;;  %506 = vmatprep.subr.bf16.mxu1 %v1161_v25  ;;  %v1219_v2 = vld [vmem:[%s1396_s0] ss:$8 sps:$4 sm:$0xff]   ;;  %v1231_v11 = vld [vmem:[#allocation4 + $0xd0] sm:$0xff]   ;;  %v1234_v14 = vld [vmem:[#allocation4 + $0x58] sm:$0xff]  }
  0x3e   :  { %v1223_v3 = vld [vmem:[#allocation4 + $0xc0] sm:$0xff]   ;;  %v1227_v7 = vld [vmem:[#allocation4 + $0xc8] sm:$0xff]   ;;  %v1232_v12 = vld [vmem:[#allocation4 + $0x10] sm:$0xff]  }
  0x3f   :  { %v1224_v4 = vld [vmem:[#allocation4] sm:$0xff]   ;;  %v1228_v8 = vld [vmem:[#allocation4 + $0x8] sm:$0xff]   ;;  %v1233_v13 = vld [vmem:[#allocation4 + $0x90] sm:$0xff]  }
  0x40   :  { %464 = vmatpush1.bf16.msra.mxu0 %v1163_v26  ;;  %507 = vmatpush1.bf16.msra.mxu1 %v1164_v27  ;;  %v1225_v5 = vld [vmem:[#allocation4 + $0x80] sm:$0xff]   ;;  %v1229_v9 = vld [vmem:[#allocation4 + $0x88] sm:$0xff]   ;;  %v1235_v15 = vld [vmem:[#allocation4 + $0xd8] sm:$0xff]  }
  0x41   :  { %465 = vmatprep.subr.bf16.mxu0 %v1165_v28  ;;  %508 = vmatprep.subr.bf16.mxu1 %v1167_v29  ;;  %v1236_v16 = vld [vmem:[#allocation4 + $0x18] sm:$0xff]   ;;  %v1238_v18 = vld [vmem:[#allocation4 + $0x60] sm:$0xff]   ;;  %v1242_v22 = vld [vmem:[#allocation4 + $0x68] sm:$0xff]  }
  0x42   :  { %v1237_v17 = vld [vmem:[#allocation4 + $0x98] sm:$0xff]   ;;  %v1239_v19 = vld [vmem:[#allocation4 + $0xe0] sm:$0xff]   ;;  %v1243_v23 = vld [vmem:[#allocation4 + $0xe8] sm:$0xff]  }
  0x43   :  { %v1240_v20 = vld [vmem:[#allocation4 + $0x20] sm:$0xff]   ;;  %v1244_v24 = vld [vmem:[#allocation4 + $0x28] sm:$0xff]   ;;  %v1246_v26 = vld [vmem:[#allocation4 + $0x70] sm:$0xff]  }
  0x44   :  { %466 = vmatpush1.bf16.msra.mxu0 %v1169_v30  ;;  %509 = vmatpush1.bf16.msra.mxu1 %v1170_v31  ;;  %v1241_v21 = vld [vmem:[#allocation4 + $0xa0] sm:$0xff]   ;;  %v1245_v25 = vld [vmem:[#allocation4 + $0xa8] sm:$0xff]   ;;  %v1247_v27 = vld [vmem:[#allocation4 + $0xf0] sm:$0xff]  }
  0x45   :  { %467 = vmatprep.subr.bf16.mxu0 %v1171_v32  ;;  %510 = vmatprep.subr.bf16.mxu1 %v1173_v33  ;;  %v1248_v28 = vld [vmem:[#allocation4 + $0x30] sm:$0xff]   ;;  %v1250_v30 = vld [vmem:[#allocation4 + $0x78] sm:$0xff]  }
  0x46   :  { %v1249_v29 = vld [vmem:[#allocation4 + $0xb0] sm:$0xff]   ;;  %v1251_v31 = vld [vmem:[#allocation4 + $0xf8] sm:$0xff]  }
  0x47   :  { %v1252_v32 = vld [vmem:[#allocation4 + $0x38] sm:$0xff]  }
  0x48   :  { %468 = vmatpush1.bf16.msra.mxu0 %v1175_v34  ;;  %511 = vmatpush1.bf16.msra.mxu1 %v1176_v35  ;;  %v1253_v33 = vld [vmem:[#allocation4 + $0xb8] sm:$0xff]   ;;  %v539_v34 = vlaneseq }
  0x49   :  { %469 = vmatprep.subr.bf16.mxu0 %v1177_v36  ;;  %512 = vmatprep.subr.bf16.mxu1 %v1179_v37 }
  0x4a   :  { %v540_v35 = vshrl.u32 %v539_v34, 7 }
  0x4c   :  { %470 = vmatpush1.bf16.msra.mxu0 %v1181_v38  ;;  %513 = vmatpush1.bf16.msra.mxu1 %v1182_v39  ;;  %v541_v36 = vsub.s32 0, %v540_v35  ;;  %v549_v37 = vsub.s32 2, %v540_v35  ;;  %v537_v38 = vld [vmem:[%s1398_s2] sm:$0xf]  ;;  %v545_v39 = vsub.s32 1, %v540_v35 }
  0x4d   :  { %471 = vmatprep.subr.bf16.mxu0 %v1183_v40  ;;  %514 = vmatprep.subr.bf16.mxu1 %v1185_v41  ;;  %v553_v40 = vsub.s32 3, %v540_v35  ;;  %v567_v41 = vld [vmem:[%s1399_s3] sm:$0xf] }
  0x50   :  { %472 = vmatpush1.bf16.msra.mxu0 %v1187_v42  ;;  %515 = vmatpush1.bf16.msra.mxu1 %v1188_v43  ;;  %v542_v42 = vrot.slane %v537_v38, %v541_v36  ;;  %v550_v43 = vrot.slane %v537_v38, %v549_v37 }
  0x51   :  { %473 = vmatprep.subr.bf16.mxu0 %v1189_v44  ;;  %516 = vmatprep.subr.bf16.mxu1 %v1191_v45  ;;  %v546_v44 = vrot.slane %v537_v38, %v545_v39  ;;  %v554_v45 = vrot.slane %v537_v38, %v553_v40 }
  0x54   :  { %474 = vmatpush1.bf16.msra.mxu0 %v1193_v46  ;;  %517 = vmatpush1.bf16.msra.mxu1 %v1194_v47  ;;  %v572_v46 = vrot.slane %v567_v41, %v541_v36  ;;  %v580_v47 = vrot.slane %v567_v41, %v549_v37  ;;  %v1072_v36 = vld [vmem:[%s1402_s6] ss:$0 sm:$0xff] }
  0x55   :  { %475 = vmatprep.subr.bf16.mxu0 %v1195_v49  ;;  %518 = vmatprep.subr.bf16.mxu1 %v1197_v50  ;;  %v576_v50 = vrot.slane %v567_v41, %v545_v39 }
  0x58   :  { %476 = vmatpush1.bf16.msra.mxu0 %v1199_v51  ;;  %519 = vmatpush1.bf16.msra.mxu1 %v1200_v52  ;;  %v584_v51 = vrot.slane %v567_v41, %v553_v40 }
  0x59   :  { %477 = vmatprep.subr.bf16.mxu0 %v1201_v53  ;;  %520 = vmatprep.subr.bf16.mxu1 %v1203_v54 }
  0x5c   :  { %478 = vmatpush1.bf16.msra.mxu0 %v1205_v55  ;;  %521 = vmatpush1.bf16.msra.mxu1 %v1206_v56 }
  0x5d   :  { %479 = vmatprep.subr.bf16.mxu0 %v1207_v57  ;;  %522 = vmatprep.subr.bf16.mxu1 %v1209_v58 }
  0x60   :  { %480 = vmatpush1.bf16.msra.mxu0 %v1211_v59  ;;  %523 = vmatpush1.bf16.msra.mxu1 %v1212_v60 }
  0x61   :  { %481 = vmatprep.subr.bf16.mxu0 %v1213_v61  ;;  %524 = vmatprep.subr.bf16.mxu1 %v1215_v62 }
  0x64   :  { %482 = vmatpush1.bf16.msra.mxu0 %v1217_v63  ;;  %525 = vmatpush1.bf16.msra.mxu1 %v1218_v0 }
  0x65   :  { %1073 = vmatprep.subr.bf16.mxu0 %v1222_v1  ;;  %1095 = vmatprep.subr.bf16.mxu1 %v1223_v3 }
  0x67   :  { %484 = vmatmul.mubr.bf16.vlgmr.msra.gmra.mrb[0].mxu0 %v1219_v2  ;;  %527 = vmatmul.mubr.bf16.vlgmr.msra.gmra.mrb[0].mxu1 %v1219_v2 }
  0x68   :  { %1074 = vmatpush3.bf16.msra.mxu0 %v1224_v4  ;;  %1096 = vmatpush3.bf16.msra.mxu1 %v1225_v5 }
  0x69   :  { %1075 = vmatprep.subr.bf16.mxu0 %v1226_v6  ;;  %1097 = vmatprep.subr.bf16.mxu1 %v1227_v7 }
  0x6c   :  { %1076 = vmatpush3.bf16.msra.mxu0 %v1228_v8  ;;  %1098 = vmatpush3.bf16.msra.mxu1 %v1229_v9 }
  0x6d   :  { %1077 = vmatprep.subr.bf16.mxu0 %v1230_v10  ;;  %1099 = vmatprep.subr.bf16.mxu1 %v1231_v11 }
  0x70   :  { %1078 = vmatpush3.bf16.msra.mxu0 %v1232_v12  ;;  %1100 = vmatpush3.bf16.msra.mxu1 %v1233_v13 }
  0x71   :  { %1079 = vmatprep.subr.bf16.mxu0 %v1234_v14  ;;  %1101 = vmatprep.subr.bf16.mxu1 %v1235_v15 }
  0x74   :  { %1080 = vmatpush3.bf16.msra.mxu0 %v1236_v16  ;;  %1102 = vmatpush3.bf16.msra.mxu1 %v1237_v17 }
  0x75   :  { %1081 = vmatprep.subr.bf16.mxu0 %v1238_v18  ;;  %1103 = vmatprep.subr.bf16.mxu1 %v1239_v19 }
  0x78   :  { %1082 = vmatpush3.bf16.msra.mxu0 %v1240_v20  ;;  %1104 = vmatpush3.bf16.msra.mxu1 %v1241_v21 }
  0x79   :  { %1083 = vmatprep.subr.bf16.mxu0 %v1242_v22  ;;  %1105 = vmatprep.subr.bf16.mxu1 %v1243_v23 }
  0x7c   :  { %1084 = vmatpush3.bf16.msra.mxu0 %v1244_v24  ;;  %1106 = vmatpush3.bf16.msra.mxu1 %v1245_v25 }
  0x7d   :  { %1085 = vmatprep.subr.bf16.mxu0 %v1246_v26  ;;  %1107 = vmatprep.subr.bf16.mxu1 %v1247_v27 }
  0x80   :  { %1086 = vmatpush3.bf16.msra.mxu0 %v1248_v28  ;;  %1108 = vmatpush3.bf16.msra.mxu1 %v1249_v29 }
  0x81   :  { %1087 = vmatprep.subr.bf16.mxu0 %v1250_v30  ;;  %1109 = vmatprep.subr.bf16.mxu1 %v1251_v31  ;;  %v1071_v30 = vld [vmem:[%s1401_s5] ss:$0 sm:$0xff] }
  0x84   :  { %1088 = vmatpush3.bf16.msra.mxu0 %v1252_v32  ;;  %1110 = vmatpush3.bf16.msra.mxu1 %v1253_v33 }
 0x13a   :  { %v485_v48 = vpop.f32.mrb[0].mxu0  ;;  %v528_v49 = vpop.f32.mrb[0].mxu1 }
 0x13b   :  { %v559_v52 = vmul.f32 %v542_v42, %v485_v48  ;;  %v561_v53 = vmul.f32 %v550_v43, %v528_v49  ;;  %v487_v54 = vpop.f32.mrb[1].mxu0  ;;  %v530_v55 = vpop.f32.mrb[1].mxu1 }
 0x13c   :  { %v560_v56 = vmul.f32 %v546_v44, %v487_v54  ;;  %v562_v57 = vmul.f32 %v554_v45, %v530_v55  ;;  %v489_v58 = vpop.f32.mrb[2].mxu0  ;;  %v532_v59 = vpop.f32.mrb[2].mxu1 }
 0x13d   :  { %v589_v60 = vadd.f32 %v572_v46, %v559_v52  ;;  %v591_v61 = vadd.f32 %v580_v47, %v561_v53  ;;  %v563_v62 = vmul.f32 %v542_v42, %v489_v58  ;;  %v565_v63 = vmul.f32 %v550_v43, %v532_v59  ;;  %v491_v0 = vpop.f32.mrb[3].mxu0  ;;  %v534_v1 = vpop.f32.mrb[3].mxu1 }
 0x13e   :  { %v590_v2 = vadd.f32 %v576_v50, %v560_v56  ;;  %v592_v3 = vadd.f32 %v584_v51, %v562_v57  ;;  %v564_v4 = vmul.f32 %v546_v44, %v491_v0  ;;  %v566_v5 = vmul.f32 %v554_v45, %v534_v1 }
 0x13f   :  { %v593_v6 = vadd.f32 %v572_v46, %v563_v62  ;;  %v595_v7 = vadd.f32 %v580_v47, %v565_v63  ;;  %v597_v10 = vmax.f32 %v589_v60, 0.0  ;;  %v599_v11 = vmax.f32 %v591_v61, 0.0 }
 0x140   :  { %v594_v8 = vadd.f32 %v576_v50, %v564_v4  ;;  %v596_v9 = vadd.f32 %v584_v51, %v566_v5  ;;  %v598_v14 = vmax.f32 %v590_v2, 0.0  ;;  %v600_v15 = vmax.f32 %v592_v3, 0.0 }
 0x141   :  { %v601_v12 = vmax.f32 %v593_v6, 0.0  ;;  %v603_v13 = vmax.f32 %v595_v7, 0.0 }
 0x142   :  { %v602_v16 = vmax.f32 %v594_v8, 0.0  ;;  %v604_v17 = vmax.f32 %v596_v9, 0.0 }
 0x143   :  { %v605_v18 = vpack.c.bf16 %v601_v12, %v597_v10  ;;  %v607_v19 = vpack.c.bf16 %v603_v13, %v599_v11 }
 0x144   :  { %v606_v20 = vpack.c.bf16 %v602_v16, %v598_v14  ;;  %v608_v21 = vpack.c.bf16 %v604_v17, %v600_v15 }
 0x146   :  { %897 = vmatprep.mubr.bf16.mxu0 %v606_v20  ;;  %938 = vmatprep.mubr.bf16.mxu1 %v608_v21 }
 0x147   :  { %898 = vmatmul.mubr.bf16.vlgmr.msra.gmra.mrb[4].mxu0 %v605_v18  ;;  %939 = vmatmul.mubr.bf16.vlgmr.msra.gmra.mrb[4].mxu1 %v607_v19 }
 0x21a   :  { %v1089_v22 = vpop.f32.mrb[4].mxu0  ;;  %v1111_v23 = vpop.f32.mrb[4].mxu1 }
 0x21b   :  { %v1090_v24 = vpop.f32.mrb[5].mxu0  ;;  %v1112_v25 = vpop.f32.mrb[5].mxu1 }
 0x21c   :  { %v1091_v26 = vadd.f32 %v1090_v24, %v1089_v22  ;;  %v1113_v27 = vadd.f32 %v1112_v25, %v1111_v23  ;;  %v1092_v28 = vpop.f32.mrb[6].mxu0  ;;  %v1114_v29 = vpop.f32.mrb[6].mxu1 }
 0x21d   :  { %v1093_v31 = vpop.f32.mrb[7].mxu0  ;;  %v1115_v32 = vpop.f32.mrb[7].mxu1 }
 0x21e   :  { %v941_v33 = vadd.f32 %v1113_v27, %v1091_v26  ;;  %v1094_v34 = vadd.f32 %v1093_v31, %v1092_v28  ;;  %v1116_v35 = vadd.f32 %v1115_v32, %v1114_v29 }
 0x220   :  { %v954_v37 = vmul.f32 %v1071_v30, %v941_v33  ;;  %v944_v38 = vadd.f32 %v1116_v35, %v1094_v34 }
 0x222   :  { %v963_v39 = vadd.f32 %v1072_v36, %v954_v37  ;;  %v955_v40 = vmul.f32 %v1071_v30, %v944_v38 }
 0x224   :  { %965 = vst [vmem:[%s1403_s7] sm:$0xff] %v963_v39  ;;  %v964_v41 = vadd.f32 %v1072_v36, %v955_v40 }
 0x226   :  { %966 = vst [vmem:[%s1403_s7 + $0x8] sm:$0xff] %v964_v41 }
 0x227   :  { %971 = vsyncpa [#allocation3], 1 }
 0x228   :  { %972 = vsyncpa [#allocation5], 1 }

</bundles_post_ra>
